<compile_context>
chip_gen: v6e
topology: v6e:2x2x1
jax: 0.10.0
libtpu: 0.0.40
codegen_flags: <defaults>
</compile_context>

<pallas_src>
import jax
import jax.numpy as jnp
from jax.experimental import pallas as pl
from jax.experimental.pallas import tpu as pltpu

BN_EPS = 1e-5


def _bn_relu(h, gamma, beta):
    """Training-mode BatchNorm1d (biased variance, eps=1e-5) + ReLU, affine folded.

    h: (B, H) f32; gamma/beta: (1, H) f32.
    """
    mean = jnp.mean(h, axis=0, keepdims=True)       # (1, H)
    d = h - mean                                    # (B, H)
    var = jnp.mean(d * d, axis=0, keepdims=True)    # (1, H)
    scale = gamma * jax.lax.rsqrt(var + BN_EPS)     # (1, H), rsqrt on EUP
    return jnp.maximum(d * scale + beta, 0.0)


def projection_head_kernel(
    x_ref,
    w1_ref, g1_ref, be1_ref,
    w2_ref, g2_ref, be2_ref,
    w3_ref, b3_ref,
    o_ref,
):
    # fc1 -> BN1 -> ReLU   (b1 omitted: cancelled exactly by BN mean subtraction)
    x = x_ref[...].astype(jnp.bfloat16)
    h = jnp.dot(x, w1_ref[...], preferred_element_type=jnp.float32)
    h = _bn_relu(h, g1_ref[...], be1_ref[...])

    # fc2 -> BN2 -> ReLU   (b2 omitted)
    h = jnp.dot(h.astype(jnp.bfloat16), w2_ref[...],
                preferred_element_type=jnp.float32)
    h = _bn_relu(h, g2_ref[...], be2_ref[...])

    # fc3 (bias kept)
    out = jnp.dot(h.astype(jnp.bfloat16), w3_ref[...],
                  preferred_element_type=jnp.float32) + b3_ref[...]
    o_ref[...] = out.astype(o_ref.dtype)


def _round_up(n, m):
    return ((n + m - 1) // m) * m


def _pad_to(a, target_shape):
    pads = tuple((0, t - s) for s, t in zip(a.shape, target_shape))
    if all(p == (0, 0) for p in pads):
        return a
    return jnp.pad(a, pads)


@jax.jit
def projection_head(x, params):
    B, H = x.shape
    O = params["w3"].shape[1]
    Hp = _round_up(H, 128)
    Op = _round_up(O, 128)

    # Lane-dense padding of feature dims only (batch untouched: BN stats).
    x_p = _pad_to(x, (B, Hp))
    w1 = _pad_to(params["w1"], (Hp, Hp)).astype(jnp.bfloat16)
    w2 = _pad_to(params["w2"], (Hp, Hp)).astype(jnp.bfloat16)
    w3 = _pad_to(params["w3"], (Hp, Op)).astype(jnp.bfloat16)
    g1 = _pad_to(params["g1"], (1, Hp))
    be1 = _pad_to(params["beta1"], (1, Hp))
    g2 = _pad_to(params["g2"], (1, Hp))
    be2 = _pad_to(params["beta2"], (1, Hp))
    b3 = _pad_to(params["b3"], (1, Op))

    args = (x_p, w1, g1, be1, w2, g2, be2, w3, b3)

    # VMEM budget: all operands + output + a few f32 activation temporaries.
    operand_bytes = sum(a.size * a.dtype.itemsize for a in args) + B * Op * 4
    act_bytes = 6 * B * max(Hp, Op) * 4
    vmem_bytes = int(1.5 * (operand_bytes + act_bytes)) + (1 << 20)
    vmem_bytes = min(max(vmem_bytes, 16 << 20), 64 << 20)  # cap: v7x physical

    vmem_spec = pl.BlockSpec(memory_space=pltpu.MemorySpace.VMEM)
    out_p = pl.pallas_call(
        projection_head_kernel,
        out_shape=jax.ShapeDtypeStruct((B, Op), jnp.float32),
        in_specs=[vmem_spec] * len(args),
        out_specs=vmem_spec,
        compiler_params=pltpu.CompilerParams(vmem_limit_bytes=vmem_bytes),
    )(*args)
    return out_p[:, :O]


def init_params(key, hidden_dim, output_dim):
    """nn.Linear default init (U(-1/sqrt(in), 1/sqrt(in))), BN default (g=1, b=0).
    Weights stored as (in, out) so the kernel computes x @ W + b."""
    k1, k2, k3, k4, k5, k6 = jax.random.split(key, 6)

    def lin(kw, kb, fan_in, fan_out):
        bound = 1.0 / jnp.sqrt(fan_in)
        w = jax.random.uniform(kw, (fan_in, fan_out), jnp.float32, -bound, bound)
        b = jax.random.uniform(kb, (1, fan_out), jnp.float32, -bound, bound)
        return w, b

    w1, b1 = lin(k1, k2, hidden_dim, hidden_dim)
    w2, b2 = lin(k3, k4, hidden_dim, hidden_dim)
    w3, b3 = lin(k5, k6, hidden_dim, output_dim)
    return {
        "w1": w1, "b1": b1,
        "g1": jnp.ones((1, hidden_dim), jnp.float32),
        "beta1": jnp.zeros((1, hidden_dim), jnp.float32),
        "w2": w2, "b2": b2,
        "g2": jnp.ones((1, hidden_dim), jnp.float32),
        "beta2": jnp.zeros((1, hidden_dim), jnp.float32),
        "w3": w3, "b3": b3,
    }


def _bn_ref(h, g, b):
    m = h.mean(0, keepdims=True)
    v = ((h - m) ** 2).mean(0, keepdims=True)
    return (h - m) * jax.lax.rsqrt(v + BN_EPS) * g + b


def reference_forward_f32(x, params):
    # Faithful f32 reference of the PyTorch module (training-mode BN, biases kept).
    h = x @ params["w1"] + params["b1"]
    h = jnp.maximum(_bn_ref(h, params["g1"], params["beta1"]), 0.0)
    h = h @ params["w2"] + params["b2"]
    h = jnp.maximum(_bn_ref(h, params["g2"], params["beta2"]), 0.0)
    return h @ params["w3"] + params["b3"]


def reference_forward_bf16(x, params):
    # Same math with bf16 matmul inputs / f32 accumulation, mirroring the
    # kernel's MXU dtype choice (isolates Pallas-vs-XLA differences).
    def mm(a, w):
        return jnp.dot(a.astype(jnp.bfloat16), w.astype(jnp.bfloat16),
                       preferred_element_type=jnp.float32)
    h = mm(x, params["w1"]) + params["b1"]
    h = jnp.maximum(_bn_ref(h, params["g1"], params["beta1"]), 0.0)
    h = mm(h, params["w2"]) + params["b2"]
    h = jnp.maximum(_bn_ref(h, params["g2"], params["beta2"]), 0.0)
    return mm(h, params["w3"]) + params["b3"]


if __name__ == "__main__":
    def check(batch, hidden, out_dim, seed):
        key = jax.random.PRNGKey(seed)
        kx, kp = jax.random.split(key)
        x = jax.random.normal(kx, (batch, hidden), jnp.float32)
        params = init_params(kp, hidden, out_dim)

        y = jax.block_until_ready(projection_head(x, params))
        assert y.shape == (batch, out_dim)

        ref16 = reference_forward_bf16(x, params)
        ref32 = reference_forward_f32(x, params)
        err16 = float(jnp.max(jnp.abs(y - ref16)))
        err32 = float(jnp.max(jnp.abs(y - ref32)))
        assert jnp.allclose(y, ref16, atol=5e-3, rtol=5e-3), (
            f"bf16-ref max abs err = {err16}")
        assert jnp.allclose(y, ref32, atol=1e-1, rtol=1e-1), (
            f"f32-ref max abs err = {err32}")

    # Module defaults (hidden=128, output=128): lane-dense, no padding needed.
    check(batch=8, hidden=128, out_dim=128, seed=0)
    # Narrow dims exercise the 128-lane feature-padding path in the wrapper.
    check(batch=8, hidden=32, out_dim=32, seed=1)

    print("KERNEL_OK")
</pallas_src>

<mosaic_0001>
module attributes {stable_mosaic.version = 11 : i64} {
  func.func @projection_head_kernel(%arg0: memref<8x128xf32, #tpu.memory_space<vmem>>, %arg1: memref<128x128xbf16, #tpu.memory_space<vmem>>, %arg2: memref<1x128xf32, #tpu.memory_space<vmem>>, %arg3: memref<1x128xf32, #tpu.memory_space<vmem>>, %arg4: memref<128x128xbf16, #tpu.memory_space<vmem>>, %arg5: memref<1x128xf32, #tpu.memory_space<vmem>>, %arg6: memref<1x128xf32, #tpu.memory_space<vmem>>, %arg7: memref<128x128xbf16, #tpu.memory_space<vmem>>, %arg8: memref<1x128xf32, #tpu.memory_space<vmem>>, %arg9: memref<8x128xf32, #tpu.memory_space<vmem>>) attributes {dimension_semantics = [], scalar_prefetch = 0 : i64, scratch_operands = 0 : i64, tpu.core_type = #tpu.core_type<tc>} {
    %c0 = arith.constant 0 : index
    %c0_0 = arith.constant 0 : index
    %0 = vector.load %arg0[%c0, %c0_0] : memref<8x128xf32, #tpu.memory_space<vmem>>, vector<8x128xf32>
    %1 = arith.truncf %0 : vector<8x128xf32> to vector<8x128xbf16>
    %c0_1 = arith.constant 0 : index
    %c0_2 = arith.constant 0 : index
    %2 = vector.load %arg1[%c0_1, %c0_2] : memref<128x128xbf16, #tpu.memory_space<vmem>>, vector<128x128xbf16>
    %cst = arith.constant dense<0.000000e+00> : vector<8x128xf32>
    %3 = tpu.matmul %1, %2, %cst {dimension_numbers = #tpu.dot_dimension_numbers<[1], [0], [0], [1], [0, 0, 1, 1], [], []>} : vector<8x128xbf16>, vector<128x128xbf16>, vector<8x128xf32> -> vector<8x128xf32>
    %c0_3 = arith.constant 0 : index
    %c0_4 = arith.constant 0 : index
    %4 = vector.load %arg2[%c0_3, %c0_4] : memref<1x128xf32, #tpu.memory_space<vmem>>, vector<1x128xf32>
    %c0_5 = arith.constant 0 : index
    %c0_6 = arith.constant 0 : index
    %5 = vector.load %arg3[%c0_5, %c0_6] : memref<1x128xf32, #tpu.memory_space<vmem>>, vector<1x128xf32>
    %cst_7 = arith.constant dense<0.000000e+00> : vector<128xf32>
    %6 = vector.multi_reduction <add>, %3, %cst_7 [0] : vector<8x128xf32> to vector<128xf32>
    %7 = vector.shape_cast %6 : vector<128xf32> to vector<1x128xf32>
    %cst_8 = arith.constant 8.000000e+00 : f32
    %8 = vector.broadcast %cst_8 : f32 to vector<1x128xf32>
    %9 = arith.divf %7, %8 : vector<1x128xf32>
    %10 = vector.broadcast %9 : vector<1x128xf32> to vector<8x128xf32>
    %11 = arith.subf %3, %10 : vector<8x128xf32>
    %12 = arith.mulf %11, %11 : vector<8x128xf32>
    %cst_9 = arith.constant dense<0.000000e+00> : vector<128xf32>
    %13 = vector.multi_reduction <add>, %12, %cst_9 [0] : vector<8x128xf32> to vector<128xf32>
    %14 = vector.shape_cast %13 : vector<128xf32> to vector<1x128xf32>
    %cst_10 = arith.constant 8.000000e+00 : f32
    %15 = vector.broadcast %cst_10 : f32 to vector<1x128xf32>
    %16 = arith.divf %14, %15 : vector<1x128xf32>
    %cst_11 = arith.constant 9.99999974E-6 : f32
    %17 = vector.broadcast %cst_11 : f32 to vector<1x128xf32>
    %18 = arith.addf %16, %17 : vector<1x128xf32>
    %19 = math.rsqrt %18 : vector<1x128xf32>
    %20 = arith.mulf %4, %19 : vector<1x128xf32>
    %21 = vector.broadcast %20 : vector<1x128xf32> to vector<8x128xf32>
    %22 = arith.mulf %11, %21 : vector<8x128xf32>
    %23 = vector.broadcast %5 : vector<1x128xf32> to vector<8x128xf32>
    %24 = arith.addf %22, %23 : vector<8x128xf32>
    %cst_12 = arith.constant 0.000000e+00 : f32
    %25 = vector.broadcast %cst_12 : f32 to vector<8x128xf32>
    %26 = arith.maximumf %24, %25 : vector<8x128xf32>
    %27 = arith.truncf %26 : vector<8x128xf32> to vector<8x128xbf16>
    %c0_13 = arith.constant 0 : index
    %c0_14 = arith.constant 0 : index
    %28 = vector.load %arg4[%c0_13, %c0_14] : memref<128x128xbf16, #tpu.memory_space<vmem>>, vector<128x128xbf16>
    %cst_15 = arith.constant dense<0.000000e+00> : vector<8x128xf32>
    %29 = tpu.matmul %27, %28, %cst_15 {dimension_numbers = #tpu.dot_dimension_numbers<[1], [0], [0], [1], [0, 0, 1, 1], [], []>} : vector<8x128xbf16>, vector<128x128xbf16>, vector<8x128xf32> -> vector<8x128xf32>
    %c0_16 = arith.constant 0 : index
    %c0_17 = arith.constant 0 : index
    %30 = vector.load %arg5[%c0_16, %c0_17] : memref<1x128xf32, #tpu.memory_space<vmem>>, vector<1x128xf32>
    %c0_18 = arith.constant 0 : index
    %c0_19 = arith.constant 0 : index
    %31 = vector.load %arg6[%c0_18, %c0_19] : memref<1x128xf32, #tpu.memory_space<vmem>>, vector<1x128xf32>
    %cst_20 = arith.constant dense<0.000000e+00> : vector<128xf32>
    %32 = vector.multi_reduction <add>, %29, %cst_20 [0] : vector<8x128xf32> to vector<128xf32>
    %33 = vector.shape_cast %32 : vector<128xf32> to vector<1x128xf32>
    %cst_21 = arith.constant 8.000000e+00 : f32
    %34 = vector.broadcast %cst_21 : f32 to vector<1x128xf32>
    %35 = arith.divf %33, %34 : vector<1x128xf32>
    %36 = vector.broadcast %35 : vector<1x128xf32> to vector<8x128xf32>
    %37 = arith.subf %29, %36 : vector<8x128xf32>
    %38 = arith.mulf %37, %37 : vector<8x128xf32>
    %cst_22 = arith.constant dense<0.000000e+00> : vector<128xf32>
    %39 = vector.multi_reduction <add>, %38, %cst_22 [0] : vector<8x128xf32> to vector<128xf32>
    %40 = vector.shape_cast %39 : vector<128xf32> to vector<1x128xf32>
    %cst_23 = arith.constant 8.000000e+00 : f32
    %41 = vector.broadcast %cst_23 : f32 to vector<1x128xf32>
    %42 = arith.divf %40, %41 : vector<1x128xf32>
    %cst_24 = arith.constant 9.99999974E-6 : f32
    %43 = vector.broadcast %cst_24 : f32 to vector<1x128xf32>
    %44 = arith.addf %42, %43 : vector<1x128xf32>
    %45 = math.rsqrt %44 : vector<1x128xf32>
    %46 = arith.mulf %30, %45 : vector<1x128xf32>
    %47 = vector.broadcast %46 : vector<1x128xf32> to vector<8x128xf32>
    %48 = arith.mulf %37, %47 : vector<8x128xf32>
    %49 = vector.broadcast %31 : vector<1x128xf32> to vector<8x128xf32>
    %50 = arith.addf %48, %49 : vector<8x128xf32>
    %cst_25 = arith.constant 0.000000e+00 : f32
    %51 = vector.broadcast %cst_25 : f32 to vector<8x128xf32>
    %52 = arith.maximumf %50, %51 : vector<8x128xf32>
    %53 = arith.truncf %52 : vector<8x128xf32> to vector<8x128xbf16>
    %c0_26 = arith.constant 0 : index
    %c0_27 = arith.constant 0 : index
    %54 = vector.load %arg7[%c0_26, %c0_27] : memref<128x128xbf16, #tpu.memory_space<vmem>>, vector<128x128xbf16>
    %cst_28 = arith.constant dense<0.000000e+00> : vector<8x128xf32>
    %55 = tpu.matmul %53, %54, %cst_28 {dimension_numbers = #tpu.dot_dimension_numbers<[1], [0], [0], [1], [0, 0, 1, 1], [], []>} : vector<8x128xbf16>, vector<128x128xbf16>, vector<8x128xf32> -> vector<8x128xf32>
    %c0_29 = arith.constant 0 : index
    %c0_30 = arith.constant 0 : index
    %56 = vector.load %arg8[%c0_29, %c0_30] : memref<1x128xf32, #tpu.memory_space<vmem>>, vector<1x128xf32>
    %57 = vector.broadcast %56 : vector<1x128xf32> to vector<8x128xf32>
    %58 = arith.addf %55, %57 : vector<8x128xf32>
    %c0_31 = arith.constant 0 : index
    %c0_32 = arith.constant 0 : index
    %59 = vector.load %arg9[%c0_31, %c0_32] : memref<8x128xf32, #tpu.memory_space<vmem>>, vector<8x128xf32>
    tpu.vector_store %arg9[%c0_31, %c0_32], %58 {strides = array<i32>} : memref<8x128xf32, #tpu.memory_space<vmem>>, vector<8x128xf32>,
    return
  }
}

</mosaic_0001>

<bundles_post_ra>
// kernel: projection_head.1
= control target key start
LH: loop header
LB: loop body
LE: loop exit
PB: predicated region body
PF: predicated region fallthrough
CT: control target
= control target key end

     0   :  { %v612_v1 = vmov 0.0   ;;  %vm613_vm0 = vmmov 0   ;;  %s788_s0 = inlined_call_operand.vmem [shape: f32[8,128], index: 0, kind: input, shape index: {}]   ;;  %s789_s1 = inlined_call_operand.vmem [shape: bf16[128,128], index: 1, kind: input, shape index: {}]   ;;  %s790_s2 = inlined_call_operand.vmem [shape: f32[1,128], index: 2, kind: input, shape index: {}]   ;;  %s791_s3 = inlined_call_operand.vmem [shape: f32[1,128], index: 3, kind: input, shape index: {}]   ;;  %s792_s4 = inlined_call_operand.vmem [shape: bf16[128,128], index: 4, kind: input, shape index: {}]   ;;  %s793_s5 = inlined_call_operand.vmem [shape: f32[1,128], index: 5, kind: input, shape index: {}]   ;;  %s794_s6 = inlined_call_operand.vmem [shape: f32[1,128], index: 6, kind: input, shape index: {}]   ;;  %s795_s7 = inlined_call_operand.vmem [shape: bf16[128,128], index: 7, kind: input, shape index: {}]   ;;  %s796_s8 = inlined_call_operand.vmem [shape: f32[1,128], index: 8, kind: input, shape index: {}]   ;;  %s797_s9 = inlined_call_operand.hbm [shape: f32[8,128], index: 9, kind: output, shape index: {}]  }
   0x1   :  { %v562_v0 = vld [vmem:[%s789_s1 + $0x38] sm:$0xff]   ;;  %499 = vmatprep.subr.bf16.mxu0 %v612_v1  ;;  %519 = vmatprep.subr.bf16.mxu1 %v612_v1  ;;  %v563_v2 = vld [vmem:[%s789_s1 + $0x30] sm:$0xff]   ;;  %v564_v3 = vld [vmem:[%s789_s1 + $0x28] sm:$0xff]  }
   0x2   :  { %500 = vmatpush3.bf16.msra.mxu0 %v562_v0  ;;  %515 = vmatprep.mubr.msk.bf16.mxu0 %vm613_vm0, %v612_v1  ;;  %v565_v4 = vld [vmem:[%s789_s1 + $0x20] sm:$0xff]   ;;  %v566_v5 = vld [vmem:[%s789_s1 + $0x18] sm:$0xff]   ;;  %v567_v6 = vld [vmem:[%s789_s1 + $0x10] sm:$0xff]  }
   0x3   :  { %501 = vmatprep.subr.bf16.mxu0 %v612_v1  ;;  %535 = vmatprep.mubr.msk.bf16.mxu1 %vm613_vm0, %v612_v1 }
   0x6   :  { %502 = vmatpush3.bf16.msra.mxu0 %v563_v2 }
   0x7   :  { %503 = vmatprep.subr.bf16.mxu0 %v612_v1 }
   0xa   :  { %504 = vmatpush3.bf16.msra.mxu0 %v564_v3 }
   0xb   :  { %505 = vmatprep.subr.bf16.mxu0 %v612_v1 }
   0xe   :  { %506 = vmatpush3.bf16.msra.mxu0 %v565_v4 }
   0xf   :  { %507 = vmatprep.subr.bf16.mxu0 %v612_v1 }
  0x12   :  { %508 = vmatpush3.bf16.msra.mxu0 %v566_v5 }
  0x13   :  { %509 = vmatprep.subr.bf16.mxu0 %v612_v1 }
  0x14   :  { %14 = vsyncpa [#allocation3], 0  ;;  %v568_v7 = vld [vmem:[%s789_s1 + $0x8] sm:$0xff]   ;;  %v569_v8 = vld [vmem:[%s789_s1] sm:$0xff]   ;;  %v163_v40 = vlaneseq  ;;  %s614_s19 = smov [#allocation2]  }
  0x15   :  { %v34_v9 = vld [vmem:[%s788_s0] sm:$0xff]  ;;  %v570_v11 = vld [vmem:[%s792_s4 + $0x38] sm:$0xff]   ;;  %v571_v12 = vld [vmem:[%s792_s4 + $0x30] sm:$0xff]  }
  0x16   :  { %510 = vmatpush3.bf16.msra.mxu0 %v567_v6  ;;  %v35_v10 = vpack.c.bf16 %v34_v9, %v34_v9  ;;  %520 = vmatpush3.bf16.msra.mxu1 %v570_v11  ;;  %v572_v13 = vld [vmem:[%s792_s4 + $0x28] sm:$0xff]   ;;  %v573_v14 = vld [vmem:[%s792_s4 + $0x20] sm:$0xff]   ;;  %v574_v15 = vld [vmem:[%s792_s4 + $0x18] sm:$0xff]   ;;  %v164_v41 = vshrl.u32 %v163_v40, 7 }
  0x17   :  { %511 = vmatprep.subr.bf16.mxu0 %v612_v1  ;;  %521 = vmatprep.subr.bf16.mxu1 %v612_v1  ;;  %v575_v16 = vld [vmem:[%s792_s4 + $0x10] sm:$0xff]   ;;  %v576_v17 = vld [vmem:[%s792_s4 + $0x8] sm:$0xff]   ;;  %v577_v18 = vld [vmem:[%s792_s4] sm:$0xff]   ;;  %s437_s4 = sshll.u32 %s614_s19, 4  ;;  %s438_s4 = int_to_ptr.vmem [resolvable:$true] %s437_s4 }
  0x18   :  { %v140_v42 = vld [vmem:[%s790_s2] sm:$0x1]  ;;  %v165_v43 = vsub.s32 0, %v164_v41  ;;  %v578_v52 = vld [vmem:[%s795_s7 + $0x38] sm:$0xff]   ;;  %v579_v53 = vld [vmem:[%s795_s7 + $0x30] sm:$0xff]   ;;  %p595_p1 = scmp.lt.s32.totalorder %s438_s4, %s438_s4 }
  0x19   :  { %v453_v47 = vld [vmem:[%s791_s3] ss:$0 sm:$0xff]  ;;  %v580_v54 = vld [vmem:[%s795_s7 + $0x28] sm:$0xff]   ;;  %v582_v56 = vld [vmem:[%s795_s7 + $0x18] sm:$0xff]  }
  0x1a   :  { %512 = vmatpush3.bf16.msra.mxu0 %v568_v7  ;;  %522 = vmatpush3.bf16.msra.mxu1 %v571_v12  ;;  %v581_v55 = vld [vmem:[%s795_s7 + $0x20] sm:$0xff]   ;;  %v583_v57 = vld [vmem:[%s795_s7 + $0x10] sm:$0xff]   ;;  %v584_v58 = vld [vmem:[%s795_s7 + $0x8] sm:$0xff]  }
  0x1b   :  { %513 = vmatprep.subr.bf16.mxu0 %v612_v1  ;;  %523 = vmatprep.subr.bf16.mxu1 %v612_v1  ;;  %v585_v59 = vld [vmem:[%s795_s7] sm:$0xff]  }
  0x1e   :  { %514 = vmatpush3.bf16.msra.mxu0 %v569_v8  ;;  %524 = vmatpush3.bf16.msra.mxu1 %v572_v13 }
  0x1f   :  { %539 = vmatprep.subr.bf16.mxu0 %v612_v1  ;;  %525 = vmatprep.subr.bf16.mxu1 %v612_v1 }
  0x21   :  { %516 = vmatmul.mubr.bf16.vlgmr.msra.gmra.mxu0 %v35_v10 }
  0x22   :  { %555 = vmatprep.mubr.msk.bf16.mxu0 %vm613_vm0, %v612_v1  ;;  %526 = vmatpush3.bf16.msra.mxu1 %v573_v14 }
  0x23   :  { %527 = vmatprep.subr.bf16.mxu1 %v612_v1  ;;  %540 = vmatpush3.bf16.msra.mxu0 %v578_v52 }
  0x24   :  { %541 = vmatprep.subr.bf16.mxu0 %v612_v1 }
  0x26   :  { %528 = vmatpush3.bf16.msra.mxu1 %v574_v15 }
  0x27   :  { %529 = vmatprep.subr.bf16.mxu1 %v612_v1  ;;  %542 = vmatpush3.bf16.msra.mxu0 %v579_v53 }
  0x28   :  { %543 = vmatprep.subr.bf16.mxu0 %v612_v1 }
  0x2a   :  { %530 = vmatpush3.bf16.msra.mxu1 %v575_v16 }
  0x2b   :  { %531 = vmatprep.subr.bf16.mxu1 %v612_v1  ;;  %544 = vmatpush3.bf16.msra.mxu0 %v580_v54 }
  0x2c   :  { %545 = vmatprep.subr.bf16.mxu0 %v612_v1 }
  0x2e   :  { %532 = vmatpush3.bf16.msra.mxu1 %v576_v17  ;;  %v282_v17 = vld [vmem:[%s793_s5] sm:$0x1]  ;;  %s590_s5 = scalar_lea.vmem %s438_s4, 128 }
  0x2f   :  { %533 = vmatprep.subr.bf16.mxu1 %v612_v1  ;;  %546 = vmatpush3.bf16.msra.mxu0 %v581_v55  ;;  %p591_p0 = scmp.ne.s32.totalorder %s438_s4, %s590_s5  ;;  %p596_p2 = scmp.lt.s32.totalorder %s590_s5, %s590_s5 }
  0x30   :  { %547 = vmatprep.subr.bf16.mxu0 %v612_v1 }
  0x31   :  { %p597_p3 = por %p596_p2, %p595_p1 }
  0x32   :  { %534 = vmatpush3.bf16.msra.mxu1 %v577_v18 }
  0x33   :  { %548 = vmatpush3.bf16.msra.mxu0 %v582_v56  ;;  %p598_p4 = pnand %p597_p3, %p591_p0 }
  0x34   :  { %549 = vmatprep.subr.bf16.mxu0 %v612_v1 }
  0x37   :  { %550 = vmatpush3.bf16.msra.mxu0 %v583_v57 }
  0x38   :  { %551 = vmatprep.subr.bf16.mxu0 %v612_v1 }
  0x3b   :  { %552 = vmatpush3.bf16.msra.mxu0 %v584_v58 }
  0x3c   :  { %553 = vmatprep.subr.bf16.mxu0 %v612_v1 }
  0x3f   :  { %554 = vmatpush3.bf16.msra.mxu0 %v585_v59 }
  0xe1   :  { %v134_v19 = vpop.f32.mrf.mxu0 }
  0xe2   :  { %v142_v20 = vrot.slane %v134_v19, 4 }
  0xe3   :  { %v517_v21 = vpop.f32.mrf.mxu0 }
  0xe4   :  { %v143_v22 = vadd.f32 %v142_v20, %v134_v19  ;;  %v462_v21 = vld [vmem:[%s794_s6] ss:$0 sm:$0xff] }
  0xe5   :  { %v137_v23 = vpop.f32.mrf.mxu0 }
  0xe6   :  { %v144_v24 = vrot.slane %v143_v22, 2 }
  0xe7   :  { %v518_v25 = vpop.f32.mrf.mxu0 }
  0xe8   :  { %v145_v26 = vadd.f32 %v144_v24, %v143_v22 }
  0xea   :  { %v146_v27 = vrot.slane %v145_v26, 1 }
  0xec   :  { %v147_v28 = vadd.f32 %v146_v27, %v145_v26  ;;  %v463_v26 = vld [vmem:[%s796_s8] ss:$0 sm:$0xff] }
  0xee   :  { %v149_v29 = vmul.f32 0.125, %v147_v28 }
  0xf0   :  { %v150_v30 = vsub.f32 %v134_v19, %v149_v29 }
  0xf2   :  { %v151_v31 = vmul.f32 %v150_v30, %v150_v30 }
  0xf4   :  { %v152_v32 = vrot.slane %v151_v31, 4 }
  0xf6   :  { %v153_v33 = vadd.f32 %v152_v32, %v151_v31 }
  0xf8   :  { %v154_v34 = vrot.slane %v153_v33, 2 }
  0xfa   :  { %v155_v35 = vadd.f32 %v154_v34, %v153_v33 }
  0xfc   :  { %v156_v36 = vrot.slane %v155_v35, 1 }
  0xfe   :  { %v157_v37 = vadd.f32 %v156_v36, %v155_v35 }
 0x100   :  { %v158_v38 = vmul.f32 0.125, %v157_v37 }
 0x102   :  { %v159_v39 = vadd.f32 1e-05, %v158_v38 }
 0x104   :  { %586 = vrsqrt.f32 %v159_v39 }
 0x111   :  { %v587_v44 = vpop.eup %586 }
 0x112   :  { %v161_v45 = vmul.f32 %v587_v44, %v140_v42 }
 0x114   :  { %v166_v46 = vrot.slane %v161_v45, %v165_v43 }
 0x116   :  { %v168_v48 = vmul.f32 %v166_v46, %v150_v30 }
 0x118   :  { %v175_v49 = vadd.f32 %v453_v47, %v168_v48 }
 0x11a   :  { %v176_v50 = vmax.f32 %v175_v49, 0.0 }
 0x11c   :  { %v177_v51 = vpack.c.bf16 %v176_v50, %v176_v50 }
 0x11e   :  { %536 = vmatmul.mubr.bf16.vlgmr.msra.gmra.mxu1 %v177_v51 }
 0x1de   :  { %v276_v60 = vpop.f32.mrf.mxu1 }
 0x1df   :  { %v284_v61 = vrot.slane %v276_v60, 4 }
 0x1e0   :  { %v537_v62 = vpop.f32.mrf.mxu1 }
 0x1e1   :  { %v285_v63 = vadd.f32 %v284_v61, %v276_v60 }
 0x1e2   :  { %v279_v0 = vpop.f32.mrf.mxu1 }
 0x1e3   :  { %v286_v2 = vrot.slane %v285_v63, 2 }
 0x1e4   :  { %v538_v3 = vpop.f32.mrf.mxu1 }
 0x1e5   :  { %v287_v4 = vadd.f32 %v286_v2, %v285_v63 }
 0x1e7   :  { %v288_v5 = vrot.slane %v287_v4, 1 }
 0x1e9   :  { %v289_v6 = vadd.f32 %v288_v5, %v287_v4 }
 0x1eb   :  { %v290_v7 = vmul.f32 0.125, %v289_v6 }
 0x1ed   :  { %v291_v8 = vsub.f32 %v276_v60, %v290_v7 }
 0x1ef   :  { %v292_v9 = vmul.f32 %v291_v8, %v291_v8 }
 0x1f1   :  { %v293_v10 = vrot.slane %v292_v9, 4 }
 0x1f3   :  { %v294_v1 = vadd.f32 %v293_v10, %v292_v9 }
 0x1f5   :  { %v295_v11 = vrot.slane %v294_v1, 2 }
 0x1f7   :  { %v296_v12 = vadd.f32 %v295_v11, %v294_v1 }
 0x1f9   :  { %v297_v13 = vrot.slane %v296_v12, 1 }
 0x1fb   :  { %v298_v14 = vadd.f32 %v297_v13, %v296_v12 }
 0x1fd   :  { %v299_v15 = vmul.f32 0.125, %v298_v14 }
 0x1ff   :  { %v300_v16 = vadd.f32 1e-05, %v299_v15 }
 0x201   :  { %588 = vrsqrt.f32 %v300_v16 }
 0x20e   :  { %v589_v18 = vpop.eup %588 }
 0x20f   :  { %v302_v19 = vmul.f32 %v589_v18, %v282_v17 }
 0x211   :  { %v307_v20 = vrot.slane %v302_v19, %v165_v43 }
 0x213   :  { %v309_v22 = vmul.f32 %v307_v20, %v291_v8 }
 0x215   :  { %v316_v23 = vadd.f32 %v462_v21, %v309_v22 }
 0x217   :  { %v317_v24 = vmax.f32 %v316_v23, 0.0 }
 0x219   :  { %v318_v25 = vpack.c.bf16 %v317_v24, %v317_v24 }
 0x21b   :  { %556 = vmatmul.mubr.bf16.vlgmr.msra.gmra.mxu0 %v318_v25 }
 0x2db   :  { %v424_v27 = vpop.f32.mrf.mxu0 }
 0x2dc   :  { %v425_v28 = vadd.f32 %v463_v26, %v424_v27 }
 0x2dd   :  { %v557_v29 = vpop.f32.mrf.mxu0 }
 0x2de   :  { %430 = vst [vmem:[#allocation2] sm:$0xff] %v425_v28 }
 0x2df   :  { %v427_v30 = vpop.f32.mrf.mxu0 }
 0x2e0   :  { %601 = shalt.err (!%p598_p4)
}
 0x2e1   :  { %440 = dma.vmem_to_hbm [thread:$0]  %s438_s4, 128, %s797_s9, [#allocation3]   ;;  %v558_v31 = vpop.f32.mrf.mxu0 }
 0x2e2   :  { %610 = dma.done.wait [#allocation3], 128  }
 0x2e3   :  { %611 = vsyncadd [#allocation3], 4294967168 }
 0x2e4   :  { %444 = vsyncpa [#allocation3], 1 }

</bundles_post_ra>
